<compile_context>
chip_gen: v7x
topology: tpu7x:2x2x1
jax: 0.10.0
libtpu: 0.0.40
codegen_flags: <defaults>
</compile_context>

<pallas_src>
import numpy as np
import jax
import jax.numpy as jnp
from jax.experimental import pallas as pl
from jax.experimental.pallas import tpu as pltpu

IN_PIX = 28 * 28      # 784 flattened input pixels (28x28 forced by fc1=256 -> 4*8*8)
CONV_OUT = 256        # 4 channels * 8 * 8 conv outputs = fc1 in_features
H_PAD = 128           # fc1 output 64 -> 128 (lane-dense)
O_PAD = 128           # fc2 output 10 -> 128 (lane-dense, unmasked stores)
ROW_ALIGN = 16        # bf16 sublane packing -> batch tiles multiple of 16
TM_MAX = 512          # cap on the batch tile


def convnet_kernel(x_ref, cm_ref, cb_ref, w1_ref, b1_ref, w2_ref, b2_ref, o_ref):
    # conv1 as matmul against the unrolled Toeplitz operator (bf16 MXU, f32 acc)
    conv = jnp.dot(x_ref[...], cm_ref[...], preferred_element_type=jnp.float32)
    conv = conv + cb_ref[...]
    conv = conv * conv                                           # x * x in f32
    # fc1 + bias, then square; padded hidden columns stay exactly 0
    h = jnp.dot(conv.astype(jnp.bfloat16), w1_ref[...],
                preferred_element_type=jnp.float32) + b1_ref[...]
    h = h * h
    # fc2 + bias -> lane-dense (TM, 128) unmasked store
    o_ref[...] = (jnp.dot(h.astype(jnp.bfloat16), w2_ref[...],
                          preferred_element_type=jnp.float32)
                  + b2_ref[...]).astype(o_ref.dtype)


def _build_conv_index(rows=IN_PIX):
    """Static (784, 256) gather index into the flattened conv weights.

    Entry (row, col) is the index into wc.reshape(196) that multiplies input
    pixel `row` for output feature `col = c*64 + oh*8 + ow`, or 196 (zero slot)
    if no weight applies.  Built once with numpy; independent of weight values.
    """
    c, oh, ow, kh, kw = np.meshgrid(
        np.arange(4), np.arange(8), np.arange(8), np.arange(7), np.arange(7),
        indexing="ij")
    pix = (oh * 3 + kh) * 28 + (ow * 3 + kw)      # flattened input pixel
    col = c * 64 + oh * 8 + ow                    # matches NCHW .view(-1, 256)
    widx = c * 49 + kh * 7 + kw                   # index into wc.reshape(196)
    idx = np.full((rows, CONV_OUT), 4 * 49, dtype=np.int32)   # default -> zero slot
    idx[pix.ravel(), col.ravel()] = widx.ravel()
    return jnp.asarray(idx)


_CONV_IDX = _build_conv_index()


def build_conv_operator(wc, bc):
    """(784, 256) bf16 conv-as-matmul operator + (1, 256) f32 broadcast bias."""
    table = jnp.concatenate([wc.reshape(-1).astype(jnp.float32),
                             jnp.zeros((1,), jnp.float32)])
    M = table[_CONV_IDX].astype(jnp.bfloat16)                 # gather, no scatter
    cb = jnp.repeat(bc.astype(jnp.float32), 64).reshape(1, CONV_OUT)
    return M, cb


def _round_up(n, m):
    return -(-n // m) * m


def _choose_tm(n):
    """Big tile to amortize ~0.35us/step grid overhead; keep >=2 grid steps on
    non-tiny batches so v7x's 2 TensorCores both get work."""
    n_al = max(ROW_ALIGN, _round_up(n, ROW_ALIGN))
    if n_al <= 2 * ROW_ALIGN:
        return n_al                                   # tiny batch: single step
    return min(TM_MAX, _round_up(n_al // 2, ROW_ALIGN))


def convnet_forward(x_nchw, params):
    wc, bc, w1, b1, w2, b2 = params
    N = x_nchw.shape[0]
    hidden = w1.shape[1]
    output = w2.shape[1]

    TM = _choose_tm(N)
    n_pad = _round_up(N, TM)

    # bf16 x stream (halves dominant HBM traffic). Pad the batch only if
    # needed, and only *after* the cast so any extra wrapper pass is half-width.
    x_flat = x_nchw.reshape(N, IN_PIX).astype(jnp.bfloat16)
    if n_pad != N:
        x_flat = jnp.zeros((n_pad, IN_PIX), jnp.bfloat16).at[:N].set(x_flat)

    # Conv operator + lane-dense padded fc weights (bf16); biases stay f32.
    M, cb = build_conv_operator(wc, bc)
    w1p = (jnp.zeros((CONV_OUT, H_PAD), jnp.float32)
           .at[:, :hidden].set(w1.astype(jnp.float32))).astype(jnp.bfloat16)
    b1p = jnp.zeros((1, H_PAD), jnp.float32).at[0, :hidden].set(b1.astype(jnp.float32))
    w2p = (jnp.zeros((H_PAD, O_PAD), jnp.float32)
           .at[:hidden, :output].set(w2.astype(jnp.float32))).astype(jnp.bfloat16)
    b2p = jnp.zeros((1, O_PAD), jnp.float32).at[0, :output].set(b2.astype(jnp.float32))

    grid = (n_pad // TM,)
    resident = lambda i: (0, 0)   # weights stay VMEM-resident across batch steps

    flops = 2 * n_pad * (IN_PIX * CONV_OUT + CONV_OUT * H_PAD + H_PAD * O_PAD)
    bytes_accessed = (2 * (n_pad * IN_PIX + IN_PIX * CONV_OUT
                           + CONV_OUT * H_PAD + H_PAD * O_PAD)
                      + 4 * (CONV_OUT + H_PAD + O_PAD + n_pad * O_PAD))

    out = pl.pallas_call(
        convnet_kernel,
        out_shape=jax.ShapeDtypeStruct((n_pad, O_PAD), jnp.float32),
        grid=grid,
        in_specs=[
            pl.BlockSpec((TM, IN_PIX), lambda i: (i, 0)),    # x tile (streamed, bf16)
            pl.BlockSpec((IN_PIX, CONV_OUT), resident),      # conv operator (bf16)
            pl.BlockSpec((1, CONV_OUT), resident),           # conv bias (f32)
            pl.BlockSpec((CONV_OUT, H_PAD), resident),       # fc1 weight (bf16)
            pl.BlockSpec((1, H_PAD), resident),              # fc1 bias (f32)
            pl.BlockSpec((H_PAD, O_PAD), resident),          # fc2 weight (bf16)
            pl.BlockSpec((1, O_PAD), resident),              # fc2 bias (f32)
        ],
        out_specs=pl.BlockSpec((TM, O_PAD), lambda i: (i, 0)),
        compiler_params=pltpu.CompilerParams(
            dimension_semantics=("parallel",)),
        cost_estimate=pl.CostEstimate(
            flops=flops, transcendentals=0, bytes_accessed=bytes_accessed),
    )(x_flat, M, cb, w1p, b1p, w2p, b2p)

    return out[:N, :output]


def ref_forward(x_nchw, params):
    """Pure-JAX f32 reference matching the PyTorch module."""
    wc, bc, w1, b1, w2, b2 = params
    y = jax.lax.conv_general_dilated(
        x_nchw, wc, window_strides=(3, 3), padding="VALID",
        dimension_numbers=("NCHW", "OIHW", "NCHW"))
    y = y + bc.reshape(1, 4, 1, 1)
    y = y * y
    y = y.reshape(-1, 256)
    y = y @ w1 + b1
    y = y * y
    return y @ w2 + b2


def init_params(key, hidden=64, output=10):
    k = jax.random.split(key, 6)
    wc = jax.random.normal(k[0], (4, 1, 7, 7), jnp.float32) * 0.1    # conv1 (OIHW)
    bc = jax.random.normal(k[1], (4,), jnp.float32) * 0.1            # conv1 bias
    w1 = jax.random.normal(k[2], (256, hidden), jnp.float32) * 0.05  # fc1 (in, out)
    b1 = jax.random.normal(k[3], (hidden,), jnp.float32) * 0.05
    w2 = jax.random.normal(k[4], (hidden, output), jnp.float32) * 0.05  # fc2 (in, out)
    b2 = jax.random.normal(k[5], (output,), jnp.float32) * 0.05
    return (wc, bc, w1, b1, w2, b2)


if __name__ == "__main__":
    key = jax.random.PRNGKey(0)
    kx, kp = jax.random.split(key)
    # batch=2, channels=1, spatial=28 (forced by fc1 in_features=256 -> 4*8*8)
    x = jax.random.normal(kx, (2, 1, 28, 28), jnp.float32)
    params = init_params(kp)

    out = jax.block_until_ready(convnet_forward(x, params))
    ref = ref_forward(x, params)

    assert out.shape == (2, 10), out.shape
    # bf16 MXU operands (f32 accumulation) + two squarings -> looser tolerance.
    assert jnp.allclose(out, ref, atol=5e-2, rtol=5e-2), (
        f"max abs err = {jnp.max(jnp.abs(out - ref))}")
    print("KERNEL_OK")
</pallas_src>

<mosaic_0001>
module attributes {stable_mosaic.version = 11 : i64} {
  func.func @convnet_kernel(%arg0: i32, %arg1: memref<16x784xbf16, #tpu.memory_space<vmem>>, %arg2: memref<784x256xbf16, #tpu.memory_space<vmem>>, %arg3: memref<1x256xf32, #tpu.memory_space<vmem>>, %arg4: memref<256x128xbf16, #tpu.memory_space<vmem>>, %arg5: memref<1x128xf32, #tpu.memory_space<vmem>>, %arg6: memref<128x128xbf16, #tpu.memory_space<vmem>>, %arg7: memref<1x128xf32, #tpu.memory_space<vmem>>, %arg8: memref<16x128xf32, #tpu.memory_space<vmem>>) attributes {dimension_semantics = [#tpu.dimension_semantics<parallel>], iteration_bounds = array<i64: 1>, scalar_prefetch = 0 : i64, scratch_operands = 0 : i64, tpu.core_type = #tpu.core_type<tc>, window_params = [{transform_indices = @transform_0, window_bounds = array<i64: 16, 784>}, {pipeline_mode = #tpu.pipeline_mode<synchronous>, transform_indices = @transform_1, window_bounds = array<i64: 784, 256>}, {pipeline_mode = #tpu.pipeline_mode<synchronous>, transform_indices = @transform_2, window_bounds = array<i64: 1, 256>}, {pipeline_mode = #tpu.pipeline_mode<synchronous>, transform_indices = @transform_3, window_bounds = array<i64: 256, 128>}, {pipeline_mode = #tpu.pipeline_mode<synchronous>, transform_indices = @transform_4, window_bounds = array<i64: 1, 128>}, {pipeline_mode = #tpu.pipeline_mode<synchronous>, transform_indices = @transform_5, window_bounds = array<i64: 128, 128>}, {pipeline_mode = #tpu.pipeline_mode<synchronous>, transform_indices = @transform_6, window_bounds = array<i64: 1, 128>}, {transform_indices = @transform_7, window_bounds = array<i64: 16, 128>}]} {
    %c0 = arith.constant 0 : index
    %c0_0 = arith.constant 0 : index
    %0 = vector.load %arg1[%c0, %c0_0] : memref<16x784xbf16, #tpu.memory_space<vmem>>, vector<16x784xbf16>
    %c0_1 = arith.constant 0 : index
    %c0_2 = arith.constant 0 : index
    %1 = vector.load %arg2[%c0_1, %c0_2] : memref<784x256xbf16, #tpu.memory_space<vmem>>, vector<784x256xbf16>
    %cst = arith.constant dense<0.000000e+00> : vector<16x256xf32>
    %2 = tpu.matmul %0, %1, %cst {dimension_numbers = #tpu.dot_dimension_numbers<[1], [0], [0], [1], [0, 0, 1, 1], [], []>} : vector<16x784xbf16>, vector<784x256xbf16>, vector<16x256xf32> -> vector<16x256xf32>
    %c0_3 = arith.constant 0 : index
    %c0_4 = arith.constant 0 : index
    %3 = vector.load %arg3[%c0_3, %c0_4] : memref<1x256xf32, #tpu.memory_space<vmem>>, vector<1x256xf32>
    %4 = vector.broadcast %3 : vector<1x256xf32> to vector<16x256xf32>
    %5 = arith.addf %2, %4 : vector<16x256xf32>
    %6 = arith.mulf %5, %5 : vector<16x256xf32>
    %7 = arith.truncf %6 : vector<16x256xf32> to vector<16x256xbf16>
    %c0_5 = arith.constant 0 : index
    %c0_6 = arith.constant 0 : index
    %8 = vector.load %arg4[%c0_5, %c0_6] : memref<256x128xbf16, #tpu.memory_space<vmem>>, vector<256x128xbf16>
    %cst_7 = arith.constant dense<0.000000e+00> : vector<16x128xf32>
    %9 = tpu.matmul %7, %8, %cst_7 {dimension_numbers = #tpu.dot_dimension_numbers<[1], [0], [0], [1], [0, 0, 1, 1], [], []>} : vector<16x256xbf16>, vector<256x128xbf16>, vector<16x128xf32> -> vector<16x128xf32>
    %c0_8 = arith.constant 0 : index
    %c0_9 = arith.constant 0 : index
    %10 = vector.load %arg5[%c0_8, %c0_9] : memref<1x128xf32, #tpu.memory_space<vmem>>, vector<1x128xf32>
    %11 = vector.broadcast %10 : vector<1x128xf32> to vector<16x128xf32>
    %12 = arith.addf %9, %11 : vector<16x128xf32>
    %13 = arith.mulf %12, %12 : vector<16x128xf32>
    %14 = arith.truncf %13 : vector<16x128xf32> to vector<16x128xbf16>
    %c0_10 = arith.constant 0 : index
    %c0_11 = arith.constant 0 : index
    %15 = vector.load %arg6[%c0_10, %c0_11] : memref<128x128xbf16, #tpu.memory_space<vmem>>, vector<128x128xbf16>
    %cst_12 = arith.constant dense<0.000000e+00> : vector<16x128xf32>
    %16 = tpu.matmul %14, %15, %cst_12 {dimension_numbers = #tpu.dot_dimension_numbers<[1], [0], [0], [1], [0, 0, 1, 1], [], []>} : vector<16x128xbf16>, vector<128x128xbf16>, vector<16x128xf32> -> vector<16x128xf32>
    %c0_13 = arith.constant 0 : index
    %c0_14 = arith.constant 0 : index
    %17 = vector.load %arg7[%c0_13, %c0_14] : memref<1x128xf32, #tpu.memory_space<vmem>>, vector<1x128xf32>
    %18 = vector.broadcast %17 : vector<1x128xf32> to vector<16x128xf32>
    %19 = arith.addf %16, %18 : vector<16x128xf32>
    %c0_15 = arith.constant 0 : index
    %c0_16 = arith.constant 0 : index
    %20 = vector.load %arg8[%c0_15, %c0_16] : memref<16x128xf32, #tpu.memory_space<vmem>>, vector<16x128xf32>
    tpu.vector_store %arg8[%c0_15, %c0_16], %19 {strides = array<i32>} : memref<16x128xf32, #tpu.memory_space<vmem>>, vector<16x128xf32>,
    return
  }
  func.func @transform_0(%arg0: i32) -> (i32, i32) {
    %c0_i32 = arith.constant 0 : i32
    %c0_i32_0 = arith.constant 0 : i32
    return %arg0, %c0_i32 : i32, i32
  }
  func.func @transform_1(%arg0: i32) -> (i32, i32) {
    %c0_i32 = arith.constant 0 : i32
    %c0_i32_0 = arith.constant 0 : i32
    %c0_i32_1 = arith.constant 0 : i32
    return %c0_i32, %c0_i32_0 : i32, i32
  }
  func.func @transform_2(%arg0: i32) -> (i32, i32) {
    %c0_i32 = arith.constant 0 : i32
    %c0_i32_0 = arith.constant 0 : i32
    %c0_i32_1 = arith.constant 0 : i32
    return %c0_i32, %c0_i32_0 : i32, i32
  }
  func.func @transform_3(%arg0: i32) -> (i32, i32) {
    %c0_i32 = arith.constant 0 : i32
    %c0_i32_0 = arith.constant 0 : i32
    %c0_i32_1 = arith.constant 0 : i32
    return %c0_i32, %c0_i32_0 : i32, i32
  }
  func.func @transform_4(%arg0: i32) -> (i32, i32) {
    %c0_i32 = arith.constant 0 : i32
    %c0_i32_0 = arith.constant 0 : i32
    %c0_i32_1 = arith.constant 0 : i32
    return %c0_i32, %c0_i32_0 : i32, i32
  }
  func.func @transform_5(%arg0: i32) -> (i32, i32) {
    %c0_i32 = arith.constant 0 : i32
    %c0_i32_0 = arith.constant 0 : i32
    %c0_i32_1 = arith.constant 0 : i32
    return %c0_i32, %c0_i32_0 : i32, i32
  }
  func.func @transform_6(%arg0: i32) -> (i32, i32) {
    %c0_i32 = arith.constant 0 : i32
    %c0_i32_0 = arith.constant 0 : i32
    %c0_i32_1 = arith.constant 0 : i32
    return %c0_i32, %c0_i32_0 : i32, i32
  }
  func.func @transform_7(%arg0: i32) -> (i32, i32) {
    %c0_i32 = arith.constant 0 : i32
    %c0_i32_0 = arith.constant 0 : i32
    return %arg0, %c0_i32 : i32, i32
  }
}

</mosaic_0001>

<bundles_post_ra>
// kernel: tpu_custom_call.1
= control target key start
LH: loop header
LB: loop body
LE: loop exit
PB: predicated region body
PF: predicated region fallthrough
CT: control target
= control target key end

     0   :  { %12 = vsyncpa [#allocation3], 0  ;;  %s1861_s0 = inlined_call_operand.hbm [shape: bf16[16,784], index: 0, kind: input, shape index: {}]   ;;  %s1862_s1 = inlined_call_operand.hbm [shape: bf16[784,256], index: 1, kind: input, shape index: {}]   ;;  %s1863_s2 = inlined_call_operand.vmem [shape: f32[1,256], index: 2, kind: input, shape index: {}]   ;;  %s1864_s3 = inlined_call_operand.hbm [shape: bf16[256,128], index: 3, kind: input, shape index: {}]   ;;  %s1865_s4 = inlined_call_operand.vmem [shape: f32[1,128], index: 4, kind: input, shape index: {}]   ;;  %s1866_s5 = inlined_call_operand.hbm [shape: bf16[128,128], index: 5, kind: input, shape index: {}]   ;;  %s1867_s6 = inlined_call_operand.vmem [shape: f32[1,128], index: 6, kind: input, shape index: {}]   ;;  %s1868_s7 = inlined_call_operand.hbm [shape: f32[16,128], index: 7, kind: output, shape index: {}]  }
   0x1   :  { %13 = vsyncpa [#allocation6], 0 }
   0x2   :  { %14 = vsyncpa [#allocation9], 0 }
   0x3   :  { %15 = vsyncpa [#allocation4], 0  ;;  %s1732_s24 = smov [#allocation5]   ;;  %s1614_s28 = scalar_lea.hbm %s1862_s1, 12544 }
   0x4   :  { %s33_s25 = sshll.u32 %s1732_s24, 4  ;;  %p1615_p0 = scmp.ne.s32.totalorder %s1862_s1, %s1614_s28  ;;  %s34_s25 = int_to_ptr.vmem [resolvable:$true] %s33_s25 }
   0x5   :  { %p1618_p1 = scmp.lt.u32.totalorder %s1614_s28, %s1862_s1 }
   0x7   :  { %p1620_p2 = pnand %p1618_p1, %p1615_p0 }
   0x9   :  { %1623 = shalt.err (!%p1620_p2)
}
   0xa   :  { %s1624_s10 = scalar_lea.vmem %s34_s25, 12544  ;;  %p1629_p4 = scmp.lt.s32.totalorder %s34_s25, %s34_s25 }
   0xb   :  { %p1625_p3 = scmp.ne.s32.totalorder %s34_s25, %s1624_s10  ;;  %p1630_p5 = scmp.lt.s32.totalorder %s1624_s10, %s1624_s10 }
   0xd   :  { %p1631_p6 = por %p1630_p5, %p1629_p4 }
   0xf   :  { %p1632_p7 = pnand %p1631_p6, %p1625_p3 }
  0x11   :  { %1635 = shalt.err (!%p1632_p7)
}
  0x12   :  { %s1733_s11 = smov 128   ;;  %s1734_s12 = smov 8  }
  0x13   :  { %39 = dma.hbm_to_vmem [thread:$0]  %s1862_s1, 12544, %s34_s25, [#allocation6], %s1733_s11, %s1733_s11, %s1734_s12  }
  0x14   :  { %s1735_s15 = smov [#allocation2]   ;;  %s1636_s19 = scalar_lea.hbm %s1861_s0, 896 }
  0x15   :  { %s21_s16 = sshll.u32 %s1735_s15, 4  ;;  %p1637_p8 = scmp.ne.s32.totalorder %s1861_s0, %s1636_s19  ;;  %s22_s16 = int_to_ptr.vmem [resolvable:$true] %s21_s16 }
  0x16   :  { %p1640_p9 = scmp.lt.u32.totalorder %s1636_s19, %s1861_s0 }
  0x18   :  { %p1642_p10 = pnand %p1640_p9, %p1637_p8 }
  0x1a   :  { %1645 = shalt.err (!%p1642_p10)
}
  0x1b   :  { %s1646_s24 = scalar_lea.vmem %s22_s16, 896  ;;  %p1651_p12 = scmp.lt.s32.totalorder %s22_s16, %s22_s16 }
  0x1c   :  { %p1647_p11 = scmp.ne.s32.totalorder %s22_s16, %s1646_s24  ;;  %p1652_p13 = scmp.lt.s32.totalorder %s1646_s24, %s1646_s24 }
  0x1e   :  { %p1653_p0 = por %p1652_p13, %p1651_p12 }
  0x20   :  { %p1654_p1 = pnand %p1653_p0, %p1647_p11 }
  0x22   :  { %1657 = shalt.err (!%p1654_p1)
}
  0x23   :  { %s1736_s1 = smov 448   ;;  %s1737_s25 = smov 28  }
  0x24   :  { %27 = dma.hbm_to_vmem [thread:$0]  %s1861_s0, 896, %s22_s16, [#allocation3], %s1736_s1, %s1736_s1, %s1737_s25  }
  0x25   :  { %s1738_s28 = smov [#allocation7]   ;;  %s1658_s9 = scalar_lea.hbm %s1864_s3, 2048 }
  0x26   :  { %s47_s29 = sshll.u32 %s1738_s28, 4  ;;  %p1659_p2 = scmp.ne.s32.totalorder %s1864_s3, %s1658_s9  ;;  %s48_s29 = int_to_ptr.vmem [resolvable:$true] %s47_s29 }
  0x27   :  { %p1662_p3 = scmp.lt.u32.totalorder %s1658_s9, %s1864_s3 }
  0x29   :  { %p1664_p4 = pnand %p1662_p3, %p1659_p2 }
  0x2b   :  { %1667 = shalt.err (!%p1664_p4)
}
  0x2c   :  { %s1668_s17 = scalar_lea.vmem %s48_s29, 2048  ;;  %p1673_p6 = scmp.lt.s32.totalorder %s48_s29, %s48_s29 }
  0x2d   :  { %p1669_p5 = scmp.ne.s32.totalorder %s48_s29, %s1668_s17  ;;  %p1674_p7 = scmp.lt.s32.totalorder %s1668_s17, %s1668_s17 }
  0x2f   :  { %p1675_p8 = por %p1674_p7, %p1673_p6 }
  0x31   :  { %p1676_p9 = pnand %p1675_p8, %p1669_p5 }
  0x33   :  { %1679 = shalt.err (!%p1676_p9)
}
  0x34   :  { %s1739_s0 = smov 64   ;;  %s1740_s16 = smov 4  }
  0x35   :  { %53 = dma.hbm_to_vmem [thread:$0]  %s1864_s3, 2048, %s48_s29, [#allocation6], %s1739_s0, %s1739_s0, %s1740_s16  }
  0x36   :  { %s1741_s20 = smov [#allocation8]   ;;  %s1680_s24 = scalar_lea.hbm %s1866_s5, 1024 }
  0x37   :  { %s61_s21 = sshll.u32 %s1741_s20, 4  ;;  %p1681_p10 = scmp.ne.s32.totalorder %s1866_s5, %s1680_s24  ;;  %s62_s21 = int_to_ptr.vmem [resolvable:$true] %s61_s21 }
  0x38   :  { %p1684_p11 = scmp.lt.u32.totalorder %s1680_s24, %s1866_s5 }
  0x3a   :  { %p1686_p12 = pnand %p1684_p11, %p1681_p10 }
  0x3c   :  { %1689 = shalt.err (!%p1686_p12)
}
  0x3d   :  { %s1690_s28 = scalar_lea.vmem %s62_s21, 1024  ;;  %p1695_p0 = scmp.lt.s32.totalorder %s62_s21, %s62_s21 }
  0x3e   :  { %p1691_p13 = scmp.ne.s32.totalorder %s62_s21, %s1690_s28  ;;  %p1696_p1 = scmp.lt.s32.totalorder %s1690_s28, %s1690_s28 }
  0x40   :  { %p1697_p2 = por %p1696_p1, %p1695_p0 }
  0x42   :  { %p1698_p3 = pnand %p1697_p2, %p1691_p13 }
  0x44   :  { %1701 = shalt.err (!%p1698_p3)
}
  0x45   :  { %67 = dma.hbm_to_vmem [thread:$0]  %s1866_s5, 1024, %s62_s21, [#allocation9], %s1739_s0, %s1739_s0, %s1740_s16  }
  0x46   :  { %1724 = dma.done.wait [#allocation3], 896  }
  0x47   :  { %1725 = vsyncadd [#allocation3], 4294966400 }
  0x48   :  { %1726 = dma.done.wait [#allocation6], 14592  }
  0x49   :  { %1727 = vsyncadd [#allocation6], 4294952704 }
  0x4a   :  { %1728 = dma.done.wait [#allocation9], 1024  }
  0x4b   :  { %1729 = vsyncadd [#allocation9], 4294966272  ;;  %v1433_v0 = vld [vmem:[#allocation5 + $0x104] ss:$8 sps:$4 sm:$0xff]   ;;  %v1435_v1 = vld [vmem:[#allocation5 + $0x100] ss:$8 sps:$4 sm:$0xff]  }
  0x4c   :  { %773 = vmatprep.subr.bf16.mxu0 %v1433_v0  ;;  %v1436_v2 = vld [vmem:[#allocation5 + $0x114] ss:$8 sps:$4 sm:$0xff]   ;;  %v1438_v3 = vld [vmem:[#allocation5 + $0x110] ss:$8 sps:$4 sm:$0xff]   ;;  %v1439_v4 = vld [vmem:[#allocation5 + $0x124] ss:$8 sps:$4 sm:$0xff]  }
  0x4d   :  { %774 = vmatpush1.bf16.msra.mxu0 %v1435_v1  ;;  %v1441_v5 = vld [vmem:[#allocation5 + $0x120] ss:$8 sps:$4 sm:$0xff]   ;;  %v1442_v6 = vld [vmem:[#allocation5 + $0x134] ss:$8 sps:$4 sm:$0xff]   ;;  %v1444_v7 = vld [vmem:[#allocation5 + $0x130] ss:$8 sps:$4 sm:$0xff]  }
  0x4e   :  { %775 = vmatprep.subr.bf16.mxu0 %v1436_v2  ;;  %v1445_v8 = vld [vmem:[#allocation5 + $0x144] ss:$8 sps:$4 sm:$0xff]   ;;  %v1447_v9 = vld [vmem:[#allocation5 + $0x140] ss:$8 sps:$4 sm:$0xff]   ;;  %v1448_v10 = vld [vmem:[#allocation5 + $0x154] ss:$8 sps:$4 sm:$0xff]  }
  0x4f   :  { %v1450_v11 = vld [vmem:[#allocation5 + $0x150] ss:$8 sps:$4 sm:$0xff]   ;;  %v1451_v12 = vld [vmem:[#allocation5 + $0x164] ss:$8 sps:$4 sm:$0xff]   ;;  %v1453_v14 = vld [vmem:[#allocation5 + $0x160] ss:$8 sps:$4 sm:$0xff]  }
  0x50   :  { %v1483_v13 = vld [vmem:[#allocation2 + $0xc] ss:$28 sps:$4 sm:$0xff]   ;;  %v1490_v16 = vld [vmem:[#allocation5 + $0x4] ss:$8 sps:$4 sm:$0xff]   ;;  %v1495_v19 = vld [vmem:[#allocation5] ss:$8 sps:$4 sm:$0xff]  }
  0x51   :  { %776 = vmatpush1.bf16.msra.mxu0 %v1438_v3  ;;  %v1454_v15 = vld [vmem:[#allocation5 + $0x174] ss:$8 sps:$4 sm:$0xff]   ;;  %805 = vmatprep.mubr.bf16.mxu0 %v1483_v13  ;;  %v1456_v17 = vld [vmem:[#allocation5 + $0x170] ss:$8 sps:$4 sm:$0xff]   ;;  %v1457_v18 = vld [vmem:[#allocation5 + $0x184] ss:$8 sps:$4 sm:$0xff]  }
  0x52   :  { %777 = vmatprep.subr.bf16.mxu0 %v1439_v4  ;;  %730 = vmatprep.subr.bf16.mxu1 %v1490_v16  ;;  %v1496_v20 = vld [vmem:[#allocation5 + $0x14] ss:$8 sps:$4 sm:$0xff]   ;;  %v1459_v21 = vld [vmem:[#allocation5 + $0x180] ss:$8 sps:$4 sm:$0xff]   ;;  %v1501_v22 = vld [vmem:[#allocation5 + $0x10] ss:$8 sps:$4 sm:$0xff]  }
  0x53   :  { %731 = vmatpush1.bf16.msra.mxu1 %v1495_v19  ;;  %v1502_v23 = vld [vmem:[#allocation5 + $0x24] ss:$8 sps:$4 sm:$0xff]   ;;  %v1460_v24 = vld [vmem:[#allocation5 + $0x194] ss:$8 sps:$4 sm:$0xff]   ;;  %v1507_v25 = vld [vmem:[#allocation5 + $0x20] ss:$8 sps:$4 sm:$0xff]  }
  0x54   :  { %732 = vmatprep.subr.bf16.mxu1 %v1496_v20  ;;  %v1508_v26 = vld [vmem:[#allocation5 + $0x34] ss:$8 sps:$4 sm:$0xff]   ;;  %v1462_v27 = vld [vmem:[#allocation5 + $0x190] ss:$8 sps:$4 sm:$0xff]   ;;  %v1463_v28 = vld [vmem:[#allocation5 + $0x1a4] ss:$8 sps:$4 sm:$0xff]  }
  0x55   :  { %778 = vmatpush1.bf16.msra.mxu0 %v1441_v5  ;;  %v1513_v29 = vld [vmem:[#allocation5 + $0x30] ss:$8 sps:$4 sm:$0xff]   ;;  %v1514_v30 = vld [vmem:[#allocation5 + $0x44] ss:$8 sps:$4 sm:$0xff]   ;;  %v1465_v31 = vld [vmem:[#allocation5 + $0x1a0] ss:$8 sps:$4 sm:$0xff]  }
  0x56   :  { %779 = vmatprep.subr.bf16.mxu0 %v1442_v6  ;;  %v1466_v32 = vld [vmem:[#allocation5 + $0x1b4] ss:$8 sps:$4 sm:$0xff]   ;;  %v1519_v33 = vld [vmem:[#allocation5 + $0x40] ss:$8 sps:$4 sm:$0xff]   ;;  %v1468_v35 = vld [vmem:[#allocation5 + $0x1b0] ss:$8 sps:$4 sm:$0xff]  }
  0x57   :  { %733 = vmatpush1.bf16.msra.mxu1 %v1501_v22  ;;  %v1520_v34 = vld [vmem:[#allocation5 + $0x54] ss:$8 sps:$4 sm:$0xff]   ;;  %v1469_v36 = vld [vmem:[#allocation5 + $0x1c4] ss:$8 sps:$4 sm:$0xff]   ;;  %v1525_v37 = vld [vmem:[#allocation5 + $0x50] ss:$8 sps:$4 sm:$0xff]  }
  0x58   :  { %734 = vmatprep.subr.bf16.mxu1 %v1502_v23  ;;  %v1526_v38 = vld [vmem:[#allocation5 + $0x64] ss:$8 sps:$4 sm:$0xff]   ;;  %v1471_v39 = vld [vmem:[#allocation5 + $0x1c0] ss:$8 sps:$4 sm:$0xff]   ;;  %v1472_v40 = vld [vmem:[#allocation5 + $0x1d4] ss:$8 sps:$4 sm:$0xff]  }
  0x59   :  { %780 = vmatpush1.bf16.msra.mxu0 %v1444_v7  ;;  %v1531_v41 = vld [vmem:[#allocation5 + $0x60] ss:$8 sps:$4 sm:$0xff]   ;;  %v1532_v42 = vld [vmem:[#allocation5 + $0x74] ss:$8 sps:$4 sm:$0xff]   ;;  %v1474_v43 = vld [vmem:[#allocation5 + $0x1d0] ss:$8 sps:$4 sm:$0xff]  }
  0x5a   :  { %781 = vmatprep.subr.bf16.mxu0 %v1445_v8  ;;  %v1475_v44 = vld [vmem:[#allocation5 + $0x1e4] ss:$8 sps:$4 sm:$0xff]   ;;  %v1537_v45 = vld [vmem:[#allocation5 + $0x70] ss:$8 sps:$4 sm:$0xff]   ;;  %v1477_v47 = vld [vmem:[#allocation5 + $0x1e0] ss:$8 sps:$4 sm:$0xff]  }
  0x5b   :  { %735 = vmatpush1.bf16.msra.mxu1 %v1507_v25  ;;  %v1538_v46 = vld [vmem:[#allocation5 + $0x84] ss:$8 sps:$4 sm:$0xff]   ;;  %v1478_v48 = vld [vmem:[#allocation5 + $0x1f4] ss:$8 sps:$4 sm:$0xff]   ;;  %v1543_v49 = vld [vmem:[#allocation5 + $0x80] ss:$8 sps:$4 sm:$0xff]  }
  0x5c   :  { %736 = vmatprep.subr.bf16.mxu1 %v1508_v26  ;;  %v1544_v50 = vld [vmem:[#allocation5 + $0x94] ss:$8 sps:$4 sm:$0xff]   ;;  %v1480_v51 = vld [vmem:[#allocation5 + $0x1f0] ss:$8 sps:$4 sm:$0xff]   ;;  %v1486_v52 = vld [vmem:[#allocation5 + $0x204] ss:$8 sps:$4 sm:$0xff]  }
  0x5d   :  { %782 = vmatpush1.bf16.msra.mxu0 %v1447_v9  ;;  %v1549_v53 = vld [vmem:[#allocation5 + $0x90] ss:$8 sps:$4 sm:$0xff]   ;;  %v1550_v55 = vld [vmem:[#allocation5 + $0xa4] ss:$8 sps:$4 sm:$0xff]   ;;  %v1484_v56 = vld [vmem:[#allocation5 + $0x200] ss:$8 sps:$4 sm:$0xff]  }
  0x5e   :  { %783 = vmatprep.subr.bf16.mxu0 %v1448_v10  ;;  %v1481_v54 = vld [vmem:[#allocation2 + $0x8] ss:$28 sps:$4 sm:$0xff]   ;;  %v1576_v57 = vld [vmem:[#allocation2 + $0x14] ss:$28 sps:$4 sm:$0xff]   ;;  %v1555_v59 = vld [vmem:[#allocation5 + $0xa0] ss:$8 sps:$4 sm:$0xff]  }
  0x5f   :  { %737 = vmatpush1.bf16.msra.mxu1 %v1513_v29  ;;  %v1489_v58 = vld [vmem:[#allocation5 + $0x214] ss:$8 sps:$4 sm:$0xff]   ;;  %v1487_v61 = vld [vmem:[#allocation5 + $0x210] ss:$8 sps:$4 sm:$0xff]   ;;  %v1494_v62 = vld [vmem:[#allocation5 + $0x224] ss:$8 sps:$4 sm:$0xff]  }
  0x60   :  { %738 = vmatprep.subr.bf16.mxu1 %v1514_v30  ;;  %v1556_v60 = vld [vmem:[#allocation5 + $0xb4] ss:$8 sps:$4 sm:$0xff]   ;;  %v1561_v63 = vld [vmem:[#allocation5 + $0xb0] ss:$8 sps:$4 sm:$0xff]   ;;  %v1588_v0 = vld [vmem:[#allocation2 + $0x4] ss:$28 sps:$4 sm:$0xff]  }
  0x61   :  { %784 = vmatpush1.bf16.msra.mxu0 %v1450_v11  ;;  %v1562_v1 = vld [vmem:[#allocation5 + $0xc4] ss:$8 sps:$4 sm:$0xff]   ;;  %v1492_v2 = vld [vmem:[#allocation5 + $0x220] ss:$8 sps:$4 sm:$0xff]   ;;  %762 = vmatprep.mubr.bf16.mxu1 %v1588_v0  ;;  %v1500_v3 = vld [vmem:[#allocation5 + $0x234] ss:$8 sps:$4 sm:$0xff]  }
  0x62   :  { %785 = vmatprep.subr.bf16.mxu0 %v1451_v12  ;;  %v1567_v4 = vld [vmem:[#allocation5 + $0xc0] ss:$8 sps:$4 sm:$0xff]   ;;  %v1568_v5 = vld [vmem:[#allocation5 + $0xd4] ss:$8 sps:$4 sm:$0xff]   ;;  %v1498_v6 = vld [vmem:[#allocation5 + $0x230] ss:$8 sps:$4 sm:$0xff]  }
  0x63   :  { %739 = vmatpush1.bf16.msra.mxu1 %v1519_v33  ;;  %v1506_v7 = vld [vmem:[#allocation5 + $0x244] ss:$8 sps:$4 sm:$0xff]   ;;  %v1504_v8 = vld [vmem:[#allocation5 + $0x240] ss:$8 sps:$4 sm:$0xff]   ;;  %v1573_v9 = vld [vmem:[#allocation5 + $0xd0] ss:$8 sps:$4 sm:$0xff]  }
  0x64   :  { %740 = vmatprep.subr.bf16.mxu1 %v1520_v34  ;;  %v1577_v10 = vld [vmem:[#allocation5 + $0xe4] ss:$8 sps:$4 sm:$0xff]   ;;  %v1512_v11 = vld [vmem:[#allocation5 + $0x254] ss:$8 sps:$4 sm:$0xff]   ;;  %v1582_v12 = vld [vmem:[#allocation5 + $0xe0] ss:$8 sps:$4 sm:$0xff]  }
  0x65   :  { %786 = vmatpush1.bf16.msra.mxu0 %v1453_v14  ;;  %v1583_v13 = vld [vmem:[#allocation5 + $0xf4] ss:$8 sps:$4 sm:$0xff]   ;;  %v1510_v14 = vld [vmem:[#allocation5 + $0x250] ss:$8 sps:$4 sm:$0xff]   ;;  %v1586_v20 = vld [vmem:[#allocation2] ss:$28 sps:$4 sm:$0xff]  }
  0x66   :  { %787 = vmatprep.subr.bf16.mxu0 %v1454_v15  ;;  %v1518_v15 = vld [vmem:[#allocation5 + $0x264] ss:$8 sps:$4 sm:$0xff]   ;;  %v1585_v16 = vld [vmem:[#allocation5 + $0xf0] ss:$8 sps:$4 sm:$0xff]   ;;  %v1524_v19 = vld [vmem:[#allocation5 + $0x274] ss:$8 sps:$4 sm:$0xff]  }
  0x67   :  { %741 = vmatpush1.bf16.msra.mxu1 %v1525_v37  ;;  %v1592_v22 = vld [vmem:[#allocation7 + $0x48] sm:$0xff]   ;;  %v1594_v26 = vld [vmem:[#allocation7 + $0x50] sm:$0xff]   ;;  %v1596_v30 = vld [vmem:[#allocation7 + $0x58] sm:$0xff]   ;;  %vm726_vm0 = vcmask 130048   ;;  %vm1744_vm1 = vmmov 0   ;;  %s1745_s13 = smov [#allocation10]  }
  0x68   :  { %742 = vmatprep.subr.bf16.mxu1 %v1526_v38  ;;  %v1522_v23 = vld [vmem:[#allocation5 + $0x270] ss:$8 sps:$4 sm:$0xff]   ;;  %v1595_v29 = vld [vmem:[#allocation7 + $0x10] sm:$0xff]   ;;  %v1597_v33 = vld [vmem:[#allocation7 + $0x18] sm:$0xff]   ;;  %s1206_s14 = sshll.u32 %s1745_s13, 4  ;;  %s1207_s14 = int_to_ptr.vmem [resolvable:$true] %s1206_s14 }
  0x69   :  { %788 = vmatpush1.bf16.msra.mxu0 %v1456_v17  ;;  %v1590_v17 = vld [vmem:[#allocation7 + $0x40] sm:$0xff]   ;;  %v1593_v25 = vld [vmem:[#allocation7 + $0x8] sm:$0xff]   ;;  %v1554_v38 = vld [vmem:[#allocation5 + $0x2c4] ss:$8 sps:$4 sm:$0xff]   ;;  %p1707_p5 = scmp.lt.s32.totalorder %s1207_s14, %s1207_s14 }
  0x6a   :  { %789 = vmatprep.subr.bf16.mxu0 %v1457_v18  ;;  %v1516_v18 = vld [vmem:[#allocation5 + $0x260] ss:$8 sps:$4 sm:$0xff]   ;;  %v1598_v34 = vld [vmem:[#allocation7 + $0x60] sm:$0xff]  }
  0x6b   :  { %743 = vmatpush1.bf16.msra.mxu1 %v1531_v41  ;;  %v1546_v37 = vld [vmem:[#allocation5 + $0x2b0] ss:$8 sps:$4 sm:$0xff]  }
  0x6c   :  { %744 = vmatprep.subr.bf16.mxu1 %v1532_v42  ;;  %v1558_v41 = vld [vmem:[#allocation5 + $0x2d0] ss:$8 sps:$4 sm:$0xff]   ;;  %v1566_v42 = vld [vmem:[#allocation5 + $0x2e4] ss:$8 sps:$4 sm:$0xff]  }
  0x6d   :  { %790 = vmatpush1.bf16.msra.mxu0 %v1459_v21  ;;  %v1591_v21 = vld [vmem:[#allocation7] sm:$0xff]  }
  0x6e   :  { %791 = vmatprep.subr.bf16.mxu0 %v1460_v24  ;;  %v1530_v24 = vld [vmem:[#allocation5 + $0x284] ss:$8 sps:$4 sm:$0xff]  }
  0x6f   :  { %745 = vmatpush1.bf16.msra.mxu1 %v1537_v45  ;;  %v1570_v45 = vld [vmem:[#allocation5 + $0x2f0] ss:$8 sps:$4 sm:$0xff]  }
  0x70   :  { %746 = vmatprep.subr.bf16.mxu1 %v1538_v46  ;;  %v1581_v46 = vld [vmem:[#allocation5 + $0x304] ss:$8 sps:$4 sm:$0xff]  }
  0x71   :  { %792 = vmatpush1.bf16.msra.mxu0 %v1462_v27  ;;  %v1528_v27 = vld [vmem:[#allocation5 + $0x280] ss:$8 sps:$4 sm:$0xff]  }
  0x72   :  { %793 = vmatprep.subr.bf16.mxu0 %v1463_v28  ;;  %v1536_v28 = vld [vmem:[#allocation5 + $0x294] ss:$8 sps:$4 sm:$0xff]  }
  0x73   :  { %747 = vmatpush1.bf16.msra.mxu1 %v1543_v49  ;;  %v1742_v49 = vmov 0  }
  0x74   :  { %748 = vmatprep.subr.bf16.mxu1 %v1544_v50  ;;  %v1589_v50 = vld [vmem:[#allocation2 + $0x18] ss:$28 sps:$4 sm:$0xff]  }
  0x75   :  { %794 = vmatpush1.bf16.msra.mxu0 %v1465_v31  ;;  %v1534_v31 = vld [vmem:[#allocation5 + $0x290] ss:$8 sps:$4 sm:$0xff]  }
  0x76   :  { %795 = vmatprep.subr.bf16.mxu0 %v1466_v32  ;;  %v1542_v32 = vld [vmem:[#allocation5 + $0x2a4] ss:$8 sps:$4 sm:$0xff]  }
  0x77   :  { %749 = vmatpush1.bf16.msra.mxu1 %v1549_v53  ;;  %v1601_v53 = vld [vmem:[#allocation7 + $0x28] sm:$0xff]  }
  0x78   :  { %750 = vmatprep.subr.bf16.mxu1 %v1550_v55  ;;  %v1603_v55 = vld [vmem:[#allocation7 + $0x30] sm:$0xff]  }
  0x79   :  { %796 = vmatpush1.bf16.msra.mxu0 %v1468_v35  ;;  %v1540_v35 = vld [vmem:[#allocation5 + $0x2a0] ss:$8 sps:$4 sm:$0xff]  }
  0x7a   :  { %797 = vmatprep.subr.bf16.mxu0 %v1469_v36  ;;  %v1548_v36 = vld [vmem:[#allocation5 + $0x2b4] ss:$8 sps:$4 sm:$0xff]  }
  0x7b   :  { %751 = vmatpush1.bf16.msra.mxu1 %v1555_v59 }
  0x7c   :  { %752 = vmatprep.subr.bf16.mxu1 %v1556_v60 }
  0x7d   :  { %798 = vmatpush1.bf16.msra.mxu0 %v1471_v39  ;;  %v1552_v39 = vld [vmem:[#allocation5 + $0x2c0] ss:$8 sps:$4 sm:$0xff]  }
  0x7e   :  { %799 = vmatprep.subr.bf16.mxu0 %v1472_v40  ;;  %v1560_v40 = vld [vmem:[#allocation5 + $0x2d4] ss:$8 sps:$4 sm:$0xff]  }
  0x7f   :  { %753 = vmatpush1.bf16.msra.mxu1 %v1561_v63  ;;  %v191_v63 = vlaneseq }
  0x80   :  { %754 = vmatprep.subr.bf16.mxu1 %v1562_v1 }
  0x81   :  { %800 = vmatpush1.bf16.msra.mxu0 %v1474_v43  ;;  %v1564_v43 = vld [vmem:[#allocation5 + $0x2e0] ss:$8 sps:$4 sm:$0xff]   ;;  %v192_v0 = vshrl.u32 %v191_v63, 7 }
  0x82   :  { %801 = vmatprep.subr.bf16.mxu0 %v1475_v44  ;;  %v1572_v44 = vld [vmem:[#allocation5 + $0x2f4] ss:$8 sps:$4 sm:$0xff]  }
  0x83   :  { %755 = vmatpush1.bf16.msra.mxu1 %v1567_v4  ;;  %v193_v1 = vsub.s32 0, %v192_v0 }
  0x84   :  { %756 = vmatprep.subr.bf16.mxu1 %v1568_v5 }
  0x85   :  { %802 = vmatpush1.bf16.msra.mxu0 %v1477_v47  ;;  %v1574_v47 = vld [vmem:[#allocation2 + $0x10] ss:$28 sps:$4 sm:$0xff]  }
  0x86   :  { %803 = vmatprep.subr.bf16.mxu0 %v1478_v48  ;;  %v1579_v48 = vld [vmem:[#allocation5 + $0x300] ss:$8 sps:$4 sm:$0xff]  }
  0x87   :  { %757 = vmatpush1.bf16.msra.mxu1 %v1573_v9 }
  0x88   :  { %758 = vmatprep.subr.bf16.mxu1 %v1577_v10 }
  0x89   :  { %804 = vmatpush1.bf16.msra.mxu0 %v1480_v51  ;;  %v1599_v51 = vld [vmem:[#allocation7 + $0x20] sm:$0xff]  }
  0x8a   :  { %816 = vmatprep.subr.bf16.mxu0 %v1486_v52  ;;  %v1600_v52 = vld [vmem:[#allocation7 + $0x68] sm:$0xff]  }
  0x8b   :  { %759 = vmatpush1.bf16.msra.mxu1 %v1582_v12 }
  0x8c   :  { %806 = vmatmul.mubr.bf16.vlgmr.msra.gmra.mrb[0].mxu0 %v1481_v54  ;;  %760 = vmatprep.subr.bf16.mxu1 %v1583_v13  ;;  %v1602_v54 = vld [vmem:[#allocation7 + $0x70] sm:$0xff]  }
  0x8d   :  { %817 = vmatpush1.bf16.msra.mxu0 %v1484_v56  ;;  %848 = vmatprep.mubr.bf16.mxu0 %v1576_v57  ;;  %v1604_v56 = vld [vmem:[#allocation7 + $0x78] sm:$0xff]  }
  0x8e   :  { %818 = vmatprep.subr.bf16.mxu0 %v1489_v58  ;;  %v1605_v57 = vld [vmem:[#allocation7 + $0x38] sm:$0xff]   ;;  %v1743_v58 = vmov 0.0  }
  0x8f   :  { %761 = vmatpush1.bf16.msra.mxu1 %v1585_v16 }
  0x90   :  { %1352 = vmatprep.subr.bf16.mxu1 %v1590_v17 }
  0x91   :  { %819 = vmatpush1.bf16.msra.mxu0 %v1487_v61 }
  0x92   :  { %820 = vmatprep.subr.bf16.mxu0 %v1494_v62  ;;  %763 = vmatmul.mubr.bf16.vlgmr.msra.gmra.mrb[0].mxu1 %v1586_v20 }
  0x93   :  { %1353 = vmatpush3.bf16.msra.mxu1 %v1591_v21 }
  0x94   :  { %1354 = vmatprep.subr.bf16.mxu1 %v1592_v22 }
  0x95   :  { %821 = vmatpush1.bf16.msra.mxu0 %v1492_v2  ;;  %v189_v2 = vld [vmem:[%s1863_s2] sm:$0x3] }
  0x96   :  { %822 = vmatprep.subr.bf16.mxu0 %v1500_v3  ;;  %v197_v3 = vsub.s32 1, %v192_v0  ;;  %v194_v4 = vrot.slane %v189_v2, %v193_v1 }
  0x97   :  { %1355 = vmatpush3.bf16.msra.mxu1 %v1593_v25  ;;  %v1607_v25 = vld [vmem:[#allocation8 + $0x8] sm:$0xff]  }
  0x98   :  { %1356 = vmatprep.subr.bf16.mxu1 %v1594_v26  ;;  %v198_v5 = vrot.slane %v189_v2, %v197_v3  ;;  %v1608_v26 = vld [vmem:[#allocation8 + $0x10] sm:$0xff]  }
  0x99   :  { %823 = vmatpush1.bf16.msra.mxu0 %v1498_v6 }
  0x9a   :  { %824 = vmatprep.subr.bf16.mxu0 %v1506_v7 }
  0x9b   :  { %1357 = vmatpush3.bf16.msra.mxu1 %v1595_v29  ;;  %v1611_v29 = vld [vmem:[#allocation8 + $0x28] sm:$0xff]  }
  0x9c   :  { %1358 = vmatprep.subr.bf16.mxu1 %v1596_v30  ;;  %v1612_v30 = vld [vmem:[#allocation8 + $0x30] sm:$0xff]  }
  0x9d   :  { %825 = vmatpush1.bf16.msra.mxu0 %v1504_v8 }
  0x9e   :  { %826 = vmatprep.subr.bf16.mxu0 %v1512_v11 }
  0x9f   :  { %1359 = vmatpush3.bf16.msra.mxu1 %v1597_v33  ;;  %v1326_v33 = vld [vmem:[%s1865_s4] ss:$0 sm:$0xff]  ;;  %s1702_s4 = scalar_lea.vmem %s1207_s14, 256 }
  0xa0   :  { %1360 = vmatprep.subr.bf16.mxu1 %v1598_v34  ;;  %p1703_p4 = scmp.ne.s32.totalorder %s1207_s14, %s1702_s4  ;;  %p1708_p6 = scmp.lt.s32.totalorder %s1702_s4, %s1702_s4 }
  0xa1   :  { %827 = vmatpush1.bf16.msra.mxu0 %v1510_v14 }
  0xa2   :  { %828 = vmatprep.subr.bf16.mxu0 %v1518_v15  ;;  %p1709_p7 = por %p1708_p6, %p1707_p5 }
  0xa3   :  { %1361 = vmatpush3.bf16.msra.mxu1 %v1599_v51 }
  0xa4   :  { %1362 = vmatprep.subr.bf16.mxu1 %v1600_v52  ;;  %p1710_p8 = pnand %p1709_p7, %p1703_p4 }
  0xa5   :  { %829 = vmatpush1.bf16.msra.mxu0 %v1516_v18 }
  0xa6   :  { %830 = vmatprep.subr.bf16.mxu0 %v1524_v19 }
  0xa7   :  { %1363 = vmatpush3.bf16.msra.mxu1 %v1601_v53 }
  0xa8   :  { %1364 = vmatprep.subr.bf16.mxu1 %v1602_v54 }
  0xa9   :  { %831 = vmatpush1.bf16.msra.mxu0 %v1522_v23 }
  0xaa   :  { %832 = vmatprep.subr.bf16.mxu0 %v1530_v24  ;;  %v1606_v24 = vld [vmem:[#allocation8] sm:$0xff]  }
  0xab   :  { %1365 = vmatpush3.bf16.msra.mxu1 %v1603_v55 }
  0xac   :  { %1366 = vmatprep.subr.bf16.mxu1 %v1604_v56 }
  0xad   :  { %833 = vmatpush1.bf16.msra.mxu0 %v1528_v27  ;;  %v1609_v27 = vld [vmem:[#allocation8 + $0x18] sm:$0xff]  }
  0xae   :  { %834 = vmatprep.subr.bf16.mxu0 %v1536_v28  ;;  %v1610_v28 = vld [vmem:[#allocation8 + $0x20] sm:$0xff]  }
  0xaf   :  { %1367 = vmatpush3.bf16.msra.mxu1 %v1605_v57 }
  0xb0   :  { %1383 = vmatprep.subr.bf16.mxu1 %v1743_v58 }
  0xb1   :  { %835 = vmatpush1.bf16.msra.mxu0 %v1534_v31  ;;  %v1613_v31 = vld [vmem:[#allocation8 + $0x38] sm:$0xff]  }
  0xb2   :  { %836 = vmatprep.subr.bf16.mxu0 %v1542_v32 }
  0xb5   :  { %837 = vmatpush1.bf16.msra.mxu0 %v1540_v35 }
  0xb6   :  { %838 = vmatprep.subr.bf16.mxu0 %v1548_v36 }
  0xb9   :  { %839 = vmatpush1.bf16.msra.mxu0 %v1546_v37 }
  0xba   :  { %840 = vmatprep.subr.bf16.mxu0 %v1554_v38 }
  0xbd   :  { %841 = vmatpush1.bf16.msra.mxu0 %v1552_v39 }
  0xbe   :  { %842 = vmatprep.subr.bf16.mxu0 %v1560_v40 }
  0xc1   :  { %843 = vmatpush1.bf16.msra.mxu0 %v1558_v41 }
  0xc2   :  { %844 = vmatprep.subr.bf16.mxu0 %v1566_v42 }
  0xc5   :  { %845 = vmatpush1.bf16.msra.mxu0 %v1564_v43 }
  0xc6   :  { %846 = vmatprep.subr.bf16.mxu0 %v1572_v44  ;;  %v1343_v44 = vld [vmem:[%s1867_s6] ss:$0 sm:$0xff] }
  0xc9   :  { %847 = vmatpush1.bf16.msra.mxu0 %v1570_v45 }
  0xca   :  { %859 = vmatprep.subr.bf16.mxu0 %v1581_v46 }
  0xcc   :  { %849 = vmatmul.mubr.bf16.vlgmr.msra.gmra.mrb[0].mxu0 %v1574_v47 }
  0xcd   :  { %860 = vmatpush1.bf16.msra.mxu0 %v1579_v48  ;;  %891 = vmatprep.mubr.bf16.mxu0 %v1742_v49 }
  0xd8   :  { %1325 = vmatmul.mubr.msk.bf16.vlgmr.msra.gmra.mrb[0].mxu0 %vm726_vm0, %v1589_v50 }
 0x165   :  { %v764_v59 = vpop.f32.mrb[0].mxu1 }
 0x166   :  { %v766_v60 = vpop.f32.mrb[1].mxu1  ;;  %v765_v6 = vadd.f32 %v764_v59, %v194_v4 }
 0x167   :  { %v768_v61 = vpop.f32.mrb[2].mxu1  ;;  %v767_v7 = vadd.f32 %v766_v60, %v198_v5 }
 0x168   :  { %v770_v62 = vpop.f32.mrb[3].mxu1  ;;  %v769_v9 = vadd.f32 %v768_v61, %v194_v4 }
 0x169   :  { %v771_v12 = vadd.f32 %v770_v62, %v198_v5 }
 0x1ab   :  { %v893_v8 = vpop.f32.mrb[0].mxu0 }
 0x1ac   :  { %v1404_v10 = vadd.f32 %v893_v8, %v765_v6  ;;  %v895_v11 = vpop.f32.mrb[1].mxu0 }
 0x1ad   :  { %v1406_v13 = vadd.f32 %v895_v11, %v767_v7  ;;  %v897_v14 = vpop.f32.mrb[2].mxu0 }
 0x1ae   :  { %v1408_v15 = vadd.f32 %v897_v14, %v769_v9  ;;  %v899_v16 = vpop.f32.mrb[3].mxu0  ;;  %v902_v18 = vmul.f32 %v1404_v10, %v1404_v10 }
 0x1af   :  { %v1410_v17 = vadd.f32 %v899_v16, %v771_v12  ;;  %v903_v20 = vmul.f32 %v1406_v13, %v1406_v13 }
 0x1b0   :  { %v904_v19 = vmul.f32 %v1408_v15, %v1408_v15 }
 0x1b1   :  { %v905_v21 = vmul.f32 %v1410_v17, %v1410_v17 }
 0x1b2   :  { %v906_v22 = vpack.c.bf16 %v904_v19, %v902_v18 }
 0x1b3   :  { %v907_v23 = vpack.c.bf16 %v905_v21, %v903_v20 }
 0x1b5   :  { %1075 = vmatprep.mubr.bf16.mxu1 %v907_v23 }
 0x1b6   :  { %1076 = vmatmul.mubr.bf16.vlgmr.msra.gmra.mrb[4].mxu1 %v906_v22 }
 0x1b7   :  { %1384 = vmatpush3.bf16.msra.mxu1 %v1606_v24  ;;  %1399 = vmatprep.mubr.msk.bf16.mxu1 %vm1744_vm1, %v1743_v58 }
 0x1b8   :  { %1385 = vmatprep.subr.bf16.mxu1 %v1743_v58 }
 0x1bb   :  { %1386 = vmatpush3.bf16.msra.mxu1 %v1607_v25 }
 0x1bc   :  { %1387 = vmatprep.subr.bf16.mxu1 %v1743_v58 }
 0x1bf   :  { %1388 = vmatpush3.bf16.msra.mxu1 %v1608_v26 }
 0x1c0   :  { %1389 = vmatprep.subr.bf16.mxu1 %v1743_v58 }
 0x1c3   :  { %1390 = vmatpush3.bf16.msra.mxu1 %v1609_v27 }
 0x1c4   :  { %1391 = vmatprep.subr.bf16.mxu1 %v1743_v58 }
 0x1c7   :  { %1392 = vmatpush3.bf16.msra.mxu1 %v1610_v28 }
 0x1c8   :  { %1393 = vmatprep.subr.bf16.mxu1 %v1743_v58 }
 0x1cb   :  { %1394 = vmatpush3.bf16.msra.mxu1 %v1611_v29 }
 0x1cc   :  { %1395 = vmatprep.subr.bf16.mxu1 %v1743_v58 }
 0x1cf   :  { %1396 = vmatpush3.bf16.msra.mxu1 %v1612_v30 }
 0x1d0   :  { %1397 = vmatprep.subr.bf16.mxu1 %v1743_v58 }
 0x1d3   :  { %1398 = vmatpush3.bf16.msra.mxu1 %v1613_v31 }
 0x289   :  { %v1368_v32 = vpop.f32.mrb[4].mxu1 }
 0x28a   :  { %v1369_v34 = vpop.f32.mrb[5].mxu1 }
 0x28b   :  { %v1370_v35 = vadd.f32 %v1369_v34, %v1368_v32  ;;  %v1371_v36 = vpop.f32.mrb[6].mxu1 }
 0x28c   :  { %v1372_v37 = vpop.f32.mrb[7].mxu1 }
 0x28d   :  { %v1078_v38 = vadd.f32 %v1370_v35, %v1326_v33  ;;  %v1373_v39 = vadd.f32 %v1372_v37, %v1371_v36 }
 0x28f   :  { %v1081_v40 = vadd.f32 %v1373_v39, %v1326_v33  ;;  %v1084_v41 = vmul.f32 %v1078_v38, %v1078_v38 }
 0x291   :  { %v1085_v42 = vmul.f32 %v1081_v40, %v1081_v40 }
 0x293   :  { %v1086_v43 = vpack.c.bf16 %v1085_v42, %v1084_v41 }
 0x295   :  { %1400 = vmatmul.mubr.bf16.vlgmr.msra.gmra.mrb[8].mxu1 %v1086_v43 }
 0x368   :  { %v1192_v45 = vpop.f32.mrb[8].mxu1 }
 0x369   :  { %v1193_v46 = vadd.f32 %v1343_v44, %v1192_v45  ;;  %v1401_v47 = vpop.f32.mrb[9].mxu1 }
 0x36a   :  { %v1195_v48 = vpop.f32.mrb[10].mxu1 }
 0x36b   :  { %1199 = vst [vmem:[#allocation10] sm:$0xff] %v1193_v46  ;;  %v1196_v49 = vadd.f32 %v1343_v44, %v1195_v48  ;;  %v1402_v50 = vpop.f32.mrb[11].mxu1 }
 0x36d   :  { %1200 = vst [vmem:[#allocation10 + $0x8] sm:$0xff] %v1196_v49 }
 0x36e   :  { %1713 = shalt.err (!%p1710_p8)
}
 0x36f   :  { %s1714_s17 = scalar_lea.hbm %s1868_s7, 256 }
 0x370   :  { %p1715_p9 = scmp.ne.s32.totalorder %s1868_s7, %s1714_s17  ;;  %p1718_p10 = scmp.lt.u32.totalorder %s1714_s17, %s1868_s7 }
 0x372   :  { %p1720_p11 = pnand %p1718_p10, %p1715_p9 }
 0x374   :  { %1723 = shalt.err (!%p1720_p11)
}
 0x375   :  { %1212 = dma.vmem_to_hbm [thread:$0]  %s1207_s14, 256, %s1868_s7, [#allocation4], %s1733_s11, %s1733_s11, %s1734_s12  }
 0x376   :  { %1730 = dma.done.wait [#allocation4], 256  }
 0x377   :  { %1731 = vsyncadd [#allocation4], 4294967040 }
 0x378   :  { %1216 = vsyncpa [#allocation3], 1 }
 0x379   :  { %1217 = vsyncpa [#allocation6], 1 }
 0x37a   :  { %1218 = vsyncpa [#allocation9], 1 }
 0x37b   :  { %1219 = vsyncpa [#allocation4], 1 }

</bundles_post_ra>
